<compile_context>
chip_gen: v6e
topology: v6e:2x2x1
jax: 0.10.0
libtpu: 0.0.40
codegen_flags: <defaults>
</compile_context>

<pallas_src>
import functools

import jax
import jax.numpy as jnp
from jax.experimental import pallas as pl
from jax.experimental.pallas import tpu as pltpu

LANES = 128
ROW_TILE_MAX = 2048     # 2048 x 128 x f32 = 1 MiB per input pipeline buffer


def _num_tensorcores() -> int:
    """Best-effort TensorCores-per-chip (2 on v7x, 1 on v5e/v6e).

    Only trusts a positive report of 1 or 2 cores; anything uncertain falls
    back to 1 so a single-core chip never sees a CORE_PARALLEL axis it cannot
    satisfy (compile safety > a missed 2x on v7x).
    """
    try:
        info = pltpu.get_tpu_info()
    except Exception:
        return 1
    for name in ("num_cores", "core_count", "num_tensorcores",
                 "tensorcore_count", "num_tensor_cores",
                 "cores_per_chip", "tensorcores_per_chip"):
        v = getattr(info, name, None)
        if v is None:
            continue
        try:
            v = int(v)
        except Exception:
            continue
        if v in (1, 2):
            return v
    return 1


def _min_row_tile(*dtypes) -> int:
    """Minimum row-tile multiple: 8 sublanes x dtype packing (f32:8, bf16:16, i8:32)."""
    m = 8
    for dt in dtypes:
        itemsize = jnp.dtype(dt).itemsize
        m = max(m, 8 * max(1, 4 // itemsize))
    return m


def _sse_kernel(pred_ref, target_ref, partial_ref, *, rows, row_tile, kpc,
                mask_from):
    """Accumulates a lane-parallel (8, 128) partial sum of squared errors."""
    p = pl.program_id(0)
    k = pl.program_id(1)

    @pl.when(k == 0)
    def _():
        partial_ref[...] = jnp.zeros_like(partial_ref)

    # Stream in native dtype; cast on the VPU inside the kernel.
    d = pred_ref[...].astype(jnp.float32) - target_ref[...].astype(jnp.float32)
    dd = d * d

    def fold(x):
        # Pure vreg-wise adds into the (8, 128) accumulator; the single
        # cross-lane reduction happens once, in the wrapper.
        return x.reshape(row_tile // 8, 8, LANES).sum(axis=0)

    if mask_from is None:
        # Statically known: every grid step maps to a distinct, full block.
        partial_ref[...] += fold(dd)
    else:
        blk = p * kpc + k                       # logical (unclamped) block idx

        @pl.when(blk < mask_from)
        def _():                                # interior block: no masking
            partial_ref[...] += fold(dd)

        @pl.when(blk >= mask_from)
        def _():                                # partial last block / clamped dup
            row_ids = blk * row_tile + jax.lax.broadcasted_iota(
                jnp.int32, (row_tile, LANES), 0)
            partial_ref[...] += fold(jnp.where(row_ids < rows, dd, 0.0))


def _sse_pallas(pred2, targ2, *, rows, min_rows):
    """Sum of squared errors over a lane-dense (rows, 128) slab."""
    num_cores = _num_tensorcores()

    row_tile = min(ROW_TILE_MAX, (rows // min_rows) * min_rows)
    nblocks = pl.cdiv(rows, row_tile)
    kpc = pl.cdiv(nblocks, num_cores)           # row-blocks per core
    total_steps = num_cores * kpc

    if rows % row_tile != 0:
        mask_from = nblocks - 1                  # last real block is partial
    elif total_steps > nblocks:
        mask_from = nblocks                      # only clamped duplicates masked
    else:
        mask_from = None                         # no masking code emitted at all

    def row_block_map(p, k):
        # Clamp so the DMA never targets a fully out-of-range block; the
        # kernel masks using the *unclamped* logical index.
        return (jnp.minimum(p * kpc + k, nblocks - 1), 0)

    kernel = functools.partial(_sse_kernel, rows=rows, row_tile=row_tile,
                               kpc=kpc, mask_from=mask_from)

    bytes_in = rows * LANES * (jnp.dtype(pred2.dtype).itemsize
                               + jnp.dtype(targ2.dtype).itemsize)
    cost = pl.CostEstimate(
        flops=3 * rows * LANES,                  # sub, mul, add per element
        transcendentals=0,
        bytes_accessed=bytes_in + num_cores * 8 * LANES * 4,
    )

    if num_cores >= 2:
        # Guarantee the 2-TensorCore split on v7x (plain "parallel" does not).
        dim_sem = (pltpu.CORE_PARALLEL, pltpu.ARBITRARY)
    else:
        dim_sem = ("arbitrary", "arbitrary")

    partial = pl.pallas_call(
        kernel,
        out_shape=jax.ShapeDtypeStruct((num_cores, 8, LANES), jnp.float32),
        grid_spec=pltpu.PrefetchScalarGridSpec(
            num_scalar_prefetch=0,
            grid=(num_cores, kpc),
            in_specs=[
                pl.BlockSpec((row_tile, LANES), row_block_map),   # pred tile
                pl.BlockSpec((row_tile, LANES), row_block_map),   # target tile
            ],
            out_specs=pl.BlockSpec((None, 8, LANES), lambda p, k: (p, 0, 0)),
        ),
        compiler_params=pltpu.CompilerParams(dimension_semantics=dim_sem),
        cost_estimate=cost,
    )(pred2, targ2)

    return jnp.sum(partial)                      # single cross-lane reduction


def uncertainty_loss(pred, target, sigma):
    """Returns (loss[(1,)], unweighted_losses list, weighted_losses list)."""
    assert pred.shape == target.shape
    out_channel = sigma.shape[0]
    n_elems = pred.size

    flat_p = pred.reshape(-1)                    # free bitcast view
    flat_t = target.reshape(-1)

    min_rows = _min_row_tile(pred.dtype, target.dtype)
    rows = n_elems // LANES

    if n_elems % LANES == 0 and rows >= min_rows:
        # Lane-aligned: zero-copy (rows, 128) reshape, HBM-streaming kernel.
        sse = _sse_pallas(flat_p.reshape(rows, LANES),
                          flat_t.reshape(rows, LANES),
                          rows=rows, min_rows=min_rows)
    else:
        # Non-lane-aligned or tiny inputs: a fused JAX SSE reads the data
        # exactly once — strictly less HBM traffic than pad / prefix-slice +
        # kernel, which is what the pad path cost.
        # TODO(synk): a fully in-kernel ragged path would need pl.ANY + manual DMA.
        d = flat_p.astype(jnp.float32) - flat_t.astype(jnp.float32)
        sse = jnp.sum(d * d)

    # Tiny per-channel finalize on C scalars (plain JAX, as in the module's
    # scalar per-task loop once the shared MSE is known).
    mse = sse / jnp.float32(n_elems)                       # reduction='mean'
    sigma_f = sigma.astype(jnp.float32)
    sigma_sq = sigma_f * sigma_f
    weighted = mse * (0.5 / sigma_sq)                      # (C,)
    # sum(log(sigma^2)) == log(prod(sigma^2)), numerically more robust.
    loss = (jnp.sum(weighted) + jnp.sum(jnp.log(sigma_sq))).reshape(1)

    unweighted_losses = [mse for _ in range(out_channel)]
    weighted_losses = [weighted[i] for i in range(out_channel)]
    return loss, unweighted_losses, weighted_losses


if __name__ == "__main__":
    key = jax.random.PRNGKey(0)
    k_sig, k_pred, k_tgt = jax.random.split(key, 3)

    out_channel = 4
    # deterministic "randn" sigma parameter, as in the module __init__
    sigma = jax.random.normal(k_sig, (out_channel,), dtype=jnp.float32)

    # small NCHW-like inputs
    pred = jax.random.normal(k_pred, (2, 4, 16, 16), dtype=jnp.float32)
    target = jax.random.normal(k_tgt, (2, 4, 16, 16), dtype=jnp.float32)

    loss, unw_list, w_list = uncertainty_loss(pred, target, sigma)
    jax.block_until_ready(loss)
    jax.block_until_ready(unw_list)
    jax.block_until_ready(w_list)

    # reference check in plain JAX (matches the PyTorch forward)
    mse_ref = jnp.mean((pred - target) ** 2)
    w_ref = mse_ref * (1.0 / (2.0 * sigma ** 2))
    loss_ref = jnp.sum(w_ref) + jnp.log(jnp.prod(sigma ** 2))
    assert jnp.allclose(loss[0], loss_ref, rtol=1e-5, atol=1e-5)
    assert all(jnp.allclose(u, mse_ref, rtol=1e-5, atol=1e-5) for u in unw_list)
    assert all(jnp.allclose(wl, wr, rtol=1e-5, atol=1e-5)
               for wl, wr in zip(w_list, w_ref))

    print("KERNEL_OK")
</pallas_src>

<mosaic_0001>
module attributes {stable_mosaic.version = 11 : i64} {
  func.func @_sse_kernel(%arg0: i32, %arg1: i32, %arg2: memref<16x128xf32, #tpu.memory_space<vmem>>, %arg3: memref<16x128xf32, #tpu.memory_space<vmem>>, %arg4: memref<1x8x128xf32, #tpu.memory_space<vmem>>) attributes {dimension_semantics = [#tpu.dimension_semantics<arbitrary>, #tpu.dimension_semantics<arbitrary>], iteration_bounds = array<i64: 1, 1>, scalar_prefetch = 0 : i64, scratch_operands = 0 : i64, tpu.core_type = #tpu.core_type<tc>, window_params = [{transform_indices = @transform_0, window_bounds = array<i64: 16, 128>}, {transform_indices = @transform_1, window_bounds = array<i64: 16, 128>}, {transform_indices = @transform_2, window_bounds = array<i64: 1, 8, 128>}]} {
    %c0_i32 = arith.constant 0 : i32
    %0 = arith.cmpi eq, %arg1, %c0_i32 : i32
    %1 = arith.extui %0 : i1 to i32
    %c0_i32_0 = arith.constant 0 : i32
    %2 = arith.cmpi ne, %1, %c0_i32_0 : i32
    scf.if %2 {
      %cst_10 = arith.constant 0.000000e+00 : f32
      %15 = vector.broadcast %cst_10 : f32 to vector<8x128xf32>
      %c0_11 = arith.constant 0 : index
      %c0_12 = arith.constant 0 : index
      %c0_13 = arith.constant 0 : index
      %16 = vector.load %arg4[%c0_11, %c0_12, %c0_13] : memref<1x8x128xf32, #tpu.memory_space<vmem>>, vector<1x8x128xf32>
      %17 = vector.shape_cast %16 : vector<1x8x128xf32> to vector<8x128xf32>
      %18 = vector.shape_cast %15 : vector<8x128xf32> to vector<1x8x128xf32>
      tpu.vector_store %arg4[%c0_11, %c0_12, %c0_13], %18 {strides = array<i32>} : memref<1x8x128xf32, #tpu.memory_space<vmem>>, vector<1x8x128xf32>,
    } else {
    }
    %c0 = arith.constant 0 : index
    %c0_1 = arith.constant 0 : index
    %3 = vector.load %arg2[%c0, %c0_1] : memref<16x128xf32, #tpu.memory_space<vmem>>, vector<16x128xf32>
    %c0_2 = arith.constant 0 : index
    %c0_3 = arith.constant 0 : index
    %4 = vector.load %arg3[%c0_2, %c0_3] : memref<16x128xf32, #tpu.memory_space<vmem>>, vector<16x128xf32>
    %5 = arith.subf %3, %4 : vector<16x128xf32>
    %6 = arith.mulf %5, %5 : vector<16x128xf32>
    %c0_4 = arith.constant 0 : index
    %c0_5 = arith.constant 0 : index
    %c0_6 = arith.constant 0 : index
    %7 = vector.load %arg4[%c0_4, %c0_5, %c0_6] : memref<1x8x128xf32, #tpu.memory_space<vmem>>, vector<1x8x128xf32>
    %8 = vector.shape_cast %7 : vector<1x8x128xf32> to vector<8x128xf32>
    %9 = vector.shape_cast %6 : vector<16x128xf32> to vector<2x8x128xf32>
    %cst = arith.constant dense<0.000000e+00> : vector<8x128xf32>
    %10 = vector.multi_reduction <add>, %9, %cst [0] : vector<2x8x128xf32> to vector<8x128xf32>
    %11 = arith.addf %8, %10 : vector<8x128xf32>
    %c0_7 = arith.constant 0 : index
    %c0_8 = arith.constant 0 : index
    %c0_9 = arith.constant 0 : index
    %12 = vector.load %arg4[%c0_7, %c0_8, %c0_9] : memref<1x8x128xf32, #tpu.memory_space<vmem>>, vector<1x8x128xf32>
    %13 = vector.shape_cast %12 : vector<1x8x128xf32> to vector<8x128xf32>
    %14 = vector.shape_cast %11 : vector<8x128xf32> to vector<1x8x128xf32>
    tpu.vector_store %arg4[%c0_7, %c0_8, %c0_9], %14 {strides = array<i32>} : memref<1x8x128xf32, #tpu.memory_space<vmem>>, vector<1x8x128xf32>,
    return
  }
  func.func @transform_0(%arg0: i32, %arg1: i32) -> (i32, i32) {
    %c1_i32 = arith.constant 1 : i32
    %0 = arith.muli %arg0, %c1_i32 : i32
    %1 = arith.addi %0, %arg1 : i32
    %c0_i32 = arith.constant 0 : i32
    %2 = arith.minsi %1, %c0_i32 : i32
    %c0_i32_0 = arith.constant 0 : i32
    %c0_i32_1 = arith.constant 0 : i32
    return %2, %c0_i32_0 : i32, i32
  }
  func.func @transform_1(%arg0: i32, %arg1: i32) -> (i32, i32) {
    %c1_i32 = arith.constant 1 : i32
    %0 = arith.muli %arg0, %c1_i32 : i32
    %1 = arith.addi %0, %arg1 : i32
    %c0_i32 = arith.constant 0 : i32
    %2 = arith.minsi %1, %c0_i32 : i32
    %c0_i32_0 = arith.constant 0 : i32
    %c0_i32_1 = arith.constant 0 : i32
    return %2, %c0_i32_0 : i32, i32
  }
  func.func @transform_2(%arg0: i32, %arg1: i32) -> (i32, i32, i32) {
    %c0_i32 = arith.constant 0 : i32
    %c0_i32_0 = arith.constant 0 : i32
    %c0_i32_1 = arith.constant 0 : i32
    return %arg0, %c0_i32, %c0_i32_0 : i32, i32, i32
  }
}

</mosaic_0001>

<bundles_post_ra>
// kernel: tpu_custom_call.1
= control target key start
LH: loop header
LB: loop body
LE: loop exit
PB: predicated region body
PF: predicated region fallthrough
CT: control target
= control target key end

     0   :  { %7 = vsyncpa [#allocation3], 0  ;;  %s198_s0 = inlined_call_operand.hbm [shape: f32[16,128], index: 0, kind: input, shape index: {}]   ;;  %s199_s1 = inlined_call_operand.hbm [shape: f32[16,128], index: 1, kind: input, shape index: {}]   ;;  %s200_s2 = inlined_call_operand.hbm [shape: f32[1,8,128], index: 2, kind: output, shape index: {}]  }
   0x1   :  { %8 = vsyncpa [#allocation6], 0 }
   0x2   :  { %9 = vsyncpa [#allocation4], 0  ;;  %s169_s9 = smov [#allocation2]  }
   0x3   :  { %s21_s10 = sshll.u32 %s169_s9, 4  ;;  %s22_s10 = int_to_ptr.vmem [resolvable:$true] %s21_s10 }
   0x4   :  { %s111_s11 = scalar_lea.vmem %s22_s10, 256  ;;  %p116_p1 = scmp.lt.s32.totalorder %s22_s10, %s22_s10 }
   0x5   :  { %p112_p0 = scmp.ne.s32.totalorder %s22_s10, %s111_s11  ;;  %p117_p2 = scmp.lt.s32.totalorder %s111_s11, %s111_s11 }
   0x7   :  { %p118_p3 = por %p117_p2, %p116_p1 }
   0x9   :  { %p119_p4 = pnand %p118_p3, %p112_p0 }
   0xb   :  { %122 = shalt.err (!%p119_p4)
}
   0xc   :  { %s170_s12 = smov 128   ;;  %s171_s13 = smov 8  }
   0xd   :  { %27 = dma.hbm_to_vmem [thread:$0]  %s198_s0, 256, %s22_s10, [#allocation3], %s170_s12, %s170_s12, %s171_s13  }
   0xe   :  { %s172_s16 = smov [#allocation5]  }
   0xf   :  { %s39_s17 = sshll.u32 %s172_s16, 4  ;;  %s40_s17 = int_to_ptr.vmem [resolvable:$true] %s39_s17 }
  0x10   :  { %s131_s18 = scalar_lea.vmem %s40_s17, 256  ;;  %p136_p6 = scmp.lt.s32.totalorder %s40_s17, %s40_s17 }
  0x11   :  { %p132_p5 = scmp.ne.s32.totalorder %s40_s17, %s131_s18  ;;  %p137_p7 = scmp.lt.s32.totalorder %s131_s18, %s131_s18 }
  0x13   :  { %p138_p8 = por %p137_p7, %p136_p6 }
  0x15   :  { %p139_p9 = pnand %p138_p8, %p132_p5 }
  0x17   :  { %142 = shalt.err (!%p139_p9)
}
  0x18   :  { %45 = dma.hbm_to_vmem [thread:$0]  %s199_s1, 256, %s40_s17, [#allocation6], %s170_s12, %s170_s12, %s171_s13  }
  0x19   :  { %163 = dma.done.wait [#allocation3], 256  }
  0x1a   :  { %164 = vsyncadd [#allocation3], 4294967040 }
  0x1b   :  { %165 = dma.done.wait [#allocation6], 256  }
  0x1c   :  { %166 = vsyncadd [#allocation6], 4294967040  ;;  %v65_v0 = vld [vmem:[#allocation2] sm:$0xff]  ;;  %v66_v1 = vld [vmem:[#allocation2 + $0x8] sm:$0xff]  ;;  %s173_s0 = smov [#allocation7]  }
  0x1d   :  { %v67_v2 = vld [vmem:[#allocation5] sm:$0xff]  ;;  %v68_v3 = vld [vmem:[#allocation5 + $0x8] sm:$0xff]  ;;  %s83_s21 = sshll.u32 %s173_s0, 4  ;;  %s84_s21 = int_to_ptr.vmem [resolvable:$true] %s83_s21 }
  0x1e   :  { %v69_v4 = vsub.f32 %v65_v0, %v67_v2  ;;  %v70_v5 = vsub.f32 %v66_v1, %v68_v3  ;;  %s143_s22 = scalar_lea.vmem %s84_s21, 128  ;;  %p148_p11 = scmp.lt.s32.totalorder %s84_s21, %s84_s21 }
  0x1f   :  { %p144_p10 = scmp.ne.s32.totalorder %s84_s21, %s143_s22  ;;  %p149_p12 = scmp.lt.s32.totalorder %s143_s22, %s143_s22 }
  0x20   :  { %v71_v6 = vmul.f32 %v69_v4, %v69_v4  ;;  %v72_v7 = vmul.f32 %v70_v5, %v70_v5 }
  0x21   :  { %p150_p13 = por %p149_p12, %p148_p11 }
  0x22   :  { %v74_v8 = vadd.f32 %v72_v7, %v71_v6 }
  0x23   :  { %p151_p0 = pnand %p150_p13, %p144_p10 }
  0x24   :  { %76 = vst [vmem:[#allocation7] sm:$0xff] %v74_v8 }
  0x25   :  { %154 = shalt.err (!%p151_p0)
}
  0x26   :  { %86 = dma.vmem_to_hbm [thread:$0]  %s84_s21, 128, %s200_s2, [#allocation4]  }
  0x27   :  { %167 = dma.done.wait [#allocation4], 128  }
  0x28   :  { %168 = vsyncadd [#allocation4], 4294967168 }
  0x29   :  { %90 = vsyncpa [#allocation3], 1 }
  0x2a   :  { %91 = vsyncpa [#allocation6], 1 }
  0x2b   :  { %92 = vsyncpa [#allocation4], 1 }

</bundles_post_ra>
